<compile_context>
chip_gen: v7x
topology: tpu7x:2x2x1
jax: 0.10.0
libtpu: 0.0.40
codegen_flags: <defaults>
</compile_context>

<pallas_src>
import jax
import jax.numpy as jnp
from jax.experimental import pallas as pl
from jax.experimental.pallas import tpu as pltpu


def _mlp_kernel(x_ref, w0_ref, b0_ref, wh_ref, bh_ref, w4t_ref, b4_ref, o_ref):
    """Fused 5-layer MLP on a (indim, block_n) column tile of x^T.

    x_ref   : (indim, bn)        batch on lanes
    w0_ref  : (hdim, indim)      input layer weight (out, in)
    b0_ref  : (hdim, 1)
    wh_ref  : (3, hdim, hdim)    packed hidden1/2/3 weights (out, in)
    bh_ref  : (3, hdim, 1)
    w4t_ref : (hdim, outdim)     output layer weight, transposed to (in, out)
    b4_ref  : (outdim, 1)
    o_ref   : (outdim, bn)
    """
    indim = x_ref.shape[0]
    n_hidden = wh_ref.shape[0]
    outdim = o_ref.shape[0]

    x = x_ref[...].astype(jnp.float32)        # (indim, bn)
    w0 = w0_ref[...].astype(jnp.float32)      # (hdim, indim)
    b0 = b0_ref[...].astype(jnp.float32)      # (hdim, 1)

    # --- input_layer + tanh: K = indim is tiny -> VPU broadcast MACs, no MXU.
    acc = b0                                  # broadcasts to (hdim, bn)
    for k in range(indim):                    # static, tiny unrolled loop
        acc = acc + w0[:, k:k + 1] * x[k:k + 1, :]
    h = jnp.tanh(acc)                         # (hdim, bn)

    # --- hidden1..3 + tanh: 32x32 contractions -> MXU, f32 accumulation.
    for l in range(n_hidden):
        w = wh_ref[l].astype(jnp.float32)     # (hdim, hdim)
        b = bh_ref[l].astype(jnp.float32)     # (hdim, 1)
        h = jnp.tanh(jnp.dot(w, h, preferred_element_type=jnp.float32) + b)

    # --- output_layer ('linear'): N = outdim is tiny -> sublane reduction.
    w4t = w4t_ref[...].astype(jnp.float32)    # (hdim, outdim)
    cols = []
    for o in range(outdim):                   # static, tiny unrolled loop
        cols.append(jnp.sum(w4t[:, o:o + 1] * h, axis=0, keepdims=True))
    out = cols[0] if outdim == 1 else jnp.concatenate(cols, axis=0)
    out = out + b4_ref[...].astype(jnp.float32)

    o_ref[...] = out.astype(o_ref.dtype)


def net_4hidden_forward(x, params, block_n=1024):
    """Fused forward pass. x: (N, indim) row-major (PyTorch layout) -> (N, outdim)."""
    w0, b0, wh, bh, w4t, b4 = params
    n, indim = x.shape
    outdim = w4t.shape[1]

    # Batch goes on the lane axis.
    xT = x.T                                          # (indim, n)

    # Pick a lane tile: multiple of 128 when tiling, else the full batch.
    if n > block_n:
        bn = max(128, (block_n // 128) * 128)
        n_pad = -(-n // bn) * bn
    else:
        bn = n
        n_pad = n
    if n_pad != n:
        xT = jnp.pad(xT, ((0, 0), (0, n_pad - n)))    # zero-pad extra lanes
    grid = (n_pad // bn,)

    in_specs = [
        pl.BlockSpec((indim, bn), lambda i: (0, i)),          # x^T tile
        pl.BlockSpec(w0.shape, lambda i: (0, 0)),             # constant blocks
        pl.BlockSpec(b0.shape, lambda i: (0, 0)),
        pl.BlockSpec(wh.shape, lambda i: (0, 0, 0)),
        pl.BlockSpec(bh.shape, lambda i: (0, 0, 0)),
        pl.BlockSpec(w4t.shape, lambda i: (0, 0)),
        pl.BlockSpec(b4.shape, lambda i: (0, 0)),
    ]
    out_specs = pl.BlockSpec((outdim, bn), lambda i: (0, i))

    out_T = pl.pallas_call(
        _mlp_kernel,
        grid=grid,
        in_specs=in_specs,
        out_specs=out_specs,
        out_shape=jax.ShapeDtypeStruct((outdim, n_pad), x.dtype),
        compiler_params=pltpu.CompilerParams(
            dimension_semantics=("parallel",)),
    )(xT, w0, b0, wh, bh, w4t, b4)

    return out_T[:, :n].T                             # back to (N, outdim)


def init_params(key, indim, hidden_layer, outdim, dtype=jnp.float32):
    """Deterministic synthetic params in the packed kernel layout.

    Weights follow the torch nn.Linear (out, in) convention; hidden1..3 are
    stacked (requires uniform hidden sizes, as in typical Net_4Hidden use).
    """
    assert len(hidden_layer) == 4
    assert len(set(hidden_layer)) == 1, "packed hidden weights need uniform sizes"
    sizes = [indim] + list(hidden_layer) + [outdim]
    ws, bs = [], []
    for idx in range(len(sizes) - 1):
        fan_in, fan_out = sizes[idx], sizes[idx + 1]
        key, kw, kb = jax.random.split(key, 3)
        bound = 1.0 / float(fan_in) ** 0.5
        ws.append(jax.random.uniform(kw, (fan_out, fan_in), dtype, -bound, bound))
        bs.append(jax.random.uniform(kb, (fan_out,), dtype, -bound, bound))
    w0 = ws[0]                                              # (H, indim)
    b0 = bs[0].reshape(-1, 1)                               # (H, 1)
    wh = jnp.stack(ws[1:4], axis=0)                         # (3, H, H)
    bh = jnp.stack([b.reshape(-1, 1) for b in bs[1:4]], 0)  # (3, H, 1)
    w4t = ws[4].T                                           # (H, outdim)
    b4 = bs[4].reshape(-1, 1)                               # (outdim, 1)
    return (w0, b0, wh, bh, w4t, b4)


def reference_forward(x, params):
    """Pure-JAX reference matching the PyTorch module semantics."""
    w0, b0, wh, bh, w4t, b4 = params
    h = jnp.tanh(x @ w0.T + b0[:, 0])
    for l in range(wh.shape[0]):
        h = jnp.tanh(h @ wh[l].T + bh[l, :, 0])
    return h @ w4t + b4[:, 0]


if __name__ == "__main__":
    indim, outdim = 2, 1
    hidden_layer = (32, 32, 32, 32)

    key = jax.random.PRNGKey(0)
    key, kp = jax.random.split(key)
    params = init_params(kp, indim, hidden_layer, outdim)

    # Small case: batch fits one lane tile (block last dim == full array dim).
    key, kx = jax.random.split(key)
    x_small = jax.random.normal(kx, (8, indim), dtype=jnp.float32)
    out_small = jax.block_until_ready(net_4hidden_forward(x_small, params))
    ref_small = reference_forward(x_small, params)
    assert out_small.shape == (8, outdim)
    assert jnp.allclose(out_small, ref_small, atol=1e-5, rtol=1e-5)

    # Tiled case: exercises 128-lane tiles, padding, and a multi-step grid.
    key, kx2 = jax.random.split(key)
    x_big = jax.random.normal(kx2, (300, indim), dtype=jnp.float32)
    out_big = jax.block_until_ready(
        net_4hidden_forward(x_big, params, block_n=128))
    ref_big = reference_forward(x_big, params)
    assert out_big.shape == (300, outdim)
    assert jnp.allclose(out_big, ref_big, atol=1e-5, rtol=1e-5)

    print("KERNEL_OK")
</pallas_src>

<mosaic_0001>
module attributes {stable_mosaic.version = 11 : i64} {
  func.func @_mlp_kernel(%arg0: i32, %arg1: memref<2x8xf32, #tpu.memory_space<vmem>>, %arg2: memref<32x2xf32, #tpu.memory_space<vmem>>, %arg3: memref<32x1xf32, #tpu.memory_space<vmem>>, %arg4: memref<3x32x32xf32, #tpu.memory_space<vmem>>, %arg5: memref<3x32x1xf32, #tpu.memory_space<vmem>>, %arg6: memref<32x1xf32, #tpu.memory_space<vmem>>, %arg7: memref<1x1xf32, #tpu.memory_space<vmem>>, %arg8: memref<1x8xf32, #tpu.memory_space<vmem>>) attributes {dimension_semantics = [#tpu.dimension_semantics<parallel>], iteration_bounds = array<i64: 1>, scalar_prefetch = 0 : i64, scratch_operands = 0 : i64, tpu.core_type = #tpu.core_type<tc>, window_params = [{transform_indices = @transform_0, window_bounds = array<i64: 2, 8>}, {pipeline_mode = #tpu.pipeline_mode<synchronous>, transform_indices = @transform_1, window_bounds = array<i64: 32, 2>}, {pipeline_mode = #tpu.pipeline_mode<synchronous>, transform_indices = @transform_2, window_bounds = array<i64: 32, 1>}, {pipeline_mode = #tpu.pipeline_mode<synchronous>, transform_indices = @transform_3, window_bounds = array<i64: 3, 32, 32>}, {pipeline_mode = #tpu.pipeline_mode<synchronous>, transform_indices = @transform_4, window_bounds = array<i64: 3, 32, 1>}, {pipeline_mode = #tpu.pipeline_mode<synchronous>, transform_indices = @transform_5, window_bounds = array<i64: 32, 1>}, {pipeline_mode = #tpu.pipeline_mode<synchronous>, transform_indices = @transform_6, window_bounds = array<i64: 1, 1>}, {transform_indices = @transform_7, window_bounds = array<i64: 1, 8>}]} {
    %c0 = arith.constant 0 : index
    %c0_0 = arith.constant 0 : index
    %0 = vector.load %arg1[%c0, %c0_0] : memref<2x8xf32, #tpu.memory_space<vmem>>, vector<2x8xf32>
    %c0_1 = arith.constant 0 : index
    %c0_2 = arith.constant 0 : index
    %1 = vector.load %arg2[%c0_1, %c0_2] : memref<32x2xf32, #tpu.memory_space<vmem>>, vector<32x2xf32>
    %c0_3 = arith.constant 0 : index
    %c0_4 = arith.constant 0 : index
    %2 = vector.load %arg3[%c0_3, %c0_4] : memref<32x1xf32, #tpu.memory_space<vmem>>, vector<32x1xf32>
    %3 = vector.extract_strided_slice %1 {offsets = [0, 0], sizes = [32, 1], strides = [1, 1]} : vector<32x2xf32> to vector<32x1xf32>
    %4 = vector.extract_strided_slice %0 {offsets = [0, 0], sizes = [1, 8], strides = [1, 1]} : vector<2x8xf32> to vector<1x8xf32>
    %5 = vector.broadcast %3 : vector<32x1xf32> to vector<32x8xf32>
    %6 = vector.broadcast %4 : vector<1x8xf32> to vector<32x8xf32>
    %7 = arith.mulf %5, %6 : vector<32x8xf32>
    %8 = vector.broadcast %2 : vector<32x1xf32> to vector<32x8xf32>
    %9 = arith.addf %8, %7 : vector<32x8xf32>
    %10 = vector.extract_strided_slice %1 {offsets = [0, 1], sizes = [32, 1], strides = [1, 1]} : vector<32x2xf32> to vector<32x1xf32>
    %11 = vector.extract_strided_slice %0 {offsets = [1, 0], sizes = [1, 8], strides = [1, 1]} : vector<2x8xf32> to vector<1x8xf32>
    %12 = vector.broadcast %10 : vector<32x1xf32> to vector<32x8xf32>
    %13 = vector.broadcast %11 : vector<1x8xf32> to vector<32x8xf32>
    %14 = arith.mulf %12, %13 : vector<32x8xf32>
    %15 = arith.addf %9, %14 : vector<32x8xf32>
    %16 = math.tanh %15 : vector<32x8xf32>
    %c0_5 = arith.constant 0 : index
    %c0_6 = arith.constant 0 : index
    %c0_7 = arith.constant 0 : index
    %17 = vector.load %arg4[%c0_5, %c0_6, %c0_7] : memref<3x32x32xf32, #tpu.memory_space<vmem>>, vector<1x32x32xf32>
    %18 = vector.shape_cast %17 : vector<1x32x32xf32> to vector<32x32xf32>
    %c0_8 = arith.constant 0 : index
    %c0_9 = arith.constant 0 : index
    %c0_10 = arith.constant 0 : index
    %19 = vector.load %arg5[%c0_8, %c0_9, %c0_10] : memref<3x32x1xf32, #tpu.memory_space<vmem>>, vector<1x32x1xf32>
    %20 = vector.shape_cast %19 : vector<1x32x1xf32> to vector<32x1xf32>
    %cst = arith.constant dense<0.000000e+00> : vector<32x8xf32>
    %21 = tpu.matmul %18, %16, %cst {dimension_numbers = #tpu.dot_dimension_numbers<[1], [0], [0], [1], [0, 0, 1, 1], [], []>} : vector<32x32xf32>, vector<32x8xf32>, vector<32x8xf32> -> vector<32x8xf32>
    %22 = vector.broadcast %20 : vector<32x1xf32> to vector<32x8xf32>
    %23 = arith.addf %21, %22 : vector<32x8xf32>
    %24 = math.tanh %23 : vector<32x8xf32>
    %c1 = arith.constant 1 : index
    %c0_11 = arith.constant 0 : index
    %c0_12 = arith.constant 0 : index
    %25 = vector.load %arg4[%c1, %c0_11, %c0_12] : memref<3x32x32xf32, #tpu.memory_space<vmem>>, vector<1x32x32xf32>
    %26 = vector.shape_cast %25 : vector<1x32x32xf32> to vector<32x32xf32>
    %c1_13 = arith.constant 1 : index
    %c0_14 = arith.constant 0 : index
    %c0_15 = arith.constant 0 : index
    %27 = vector.load %arg5[%c1_13, %c0_14, %c0_15] : memref<3x32x1xf32, #tpu.memory_space<vmem>>, vector<1x32x1xf32>
    %28 = vector.shape_cast %27 : vector<1x32x1xf32> to vector<32x1xf32>
    %cst_16 = arith.constant dense<0.000000e+00> : vector<32x8xf32>
    %29 = tpu.matmul %26, %24, %cst_16 {dimension_numbers = #tpu.dot_dimension_numbers<[1], [0], [0], [1], [0, 0, 1, 1], [], []>} : vector<32x32xf32>, vector<32x8xf32>, vector<32x8xf32> -> vector<32x8xf32>
    %30 = vector.broadcast %28 : vector<32x1xf32> to vector<32x8xf32>
    %31 = arith.addf %29, %30 : vector<32x8xf32>
    %32 = math.tanh %31 : vector<32x8xf32>
    %c2 = arith.constant 2 : index
    %c0_17 = arith.constant 0 : index
    %c0_18 = arith.constant 0 : index
    %33 = vector.load %arg4[%c2, %c0_17, %c0_18] : memref<3x32x32xf32, #tpu.memory_space<vmem>>, vector<1x32x32xf32>
    %34 = vector.shape_cast %33 : vector<1x32x32xf32> to vector<32x32xf32>
    %c2_19 = arith.constant 2 : index
    %c0_20 = arith.constant 0 : index
    %c0_21 = arith.constant 0 : index
    %35 = vector.load %arg5[%c2_19, %c0_20, %c0_21] : memref<3x32x1xf32, #tpu.memory_space<vmem>>, vector<1x32x1xf32>
    %36 = vector.shape_cast %35 : vector<1x32x1xf32> to vector<32x1xf32>
    %cst_22 = arith.constant dense<0.000000e+00> : vector<32x8xf32>
    %37 = tpu.matmul %34, %32, %cst_22 {dimension_numbers = #tpu.dot_dimension_numbers<[1], [0], [0], [1], [0, 0, 1, 1], [], []>} : vector<32x32xf32>, vector<32x8xf32>, vector<32x8xf32> -> vector<32x8xf32>
    %38 = vector.broadcast %36 : vector<32x1xf32> to vector<32x8xf32>
    %39 = arith.addf %37, %38 : vector<32x8xf32>
    %40 = math.tanh %39 : vector<32x8xf32>
    %c0_23 = arith.constant 0 : index
    %c0_24 = arith.constant 0 : index
    %41 = vector.load %arg6[%c0_23, %c0_24] : memref<32x1xf32, #tpu.memory_space<vmem>>, vector<32x1xf32>
    %42 = vector.broadcast %41 : vector<32x1xf32> to vector<32x8xf32>
    %43 = arith.mulf %42, %40 : vector<32x8xf32>
    %cst_25 = arith.constant dense<0.000000e+00> : vector<8xf32>
    %44 = vector.multi_reduction <add>, %43, %cst_25 [0] : vector<32x8xf32> to vector<8xf32>
    %45 = vector.shape_cast %44 : vector<8xf32> to vector<1x8xf32>
    %c0_26 = arith.constant 0 : index
    %c0_27 = arith.constant 0 : index
    %46 = vector.load %arg7[%c0_26, %c0_27] : memref<1x1xf32, #tpu.memory_space<vmem>>, vector<1x1xf32>
    %47 = vector.broadcast %46 : vector<1x1xf32> to vector<1x8xf32>
    %48 = arith.addf %45, %47 : vector<1x8xf32>
    %c0_28 = arith.constant 0 : index
    %c0_29 = arith.constant 0 : index
    %49 = vector.load %arg8[%c0_28, %c0_29] : memref<1x8xf32, #tpu.memory_space<vmem>>, vector<1x8xf32>
    tpu.vector_store %arg8[%c0_28, %c0_29], %48 {strides = array<i32>} : memref<1x8xf32, #tpu.memory_space<vmem>>, vector<1x8xf32>,
    return
  }
  func.func @transform_0(%arg0: i32) -> (i32, i32) {
    %c0_i32 = arith.constant 0 : i32
    %c0_i32_0 = arith.constant 0 : i32
    return %c0_i32, %arg0 : i32, i32
  }
  func.func @transform_1(%arg0: i32) -> (i32, i32) {
    %c0_i32 = arith.constant 0 : i32
    %c0_i32_0 = arith.constant 0 : i32
    %c0_i32_1 = arith.constant 0 : i32
    return %c0_i32, %c0_i32_0 : i32, i32
  }
  func.func @transform_2(%arg0: i32) -> (i32, i32) {
    %c0_i32 = arith.constant 0 : i32
    %c0_i32_0 = arith.constant 0 : i32
    %c0_i32_1 = arith.constant 0 : i32
    return %c0_i32, %c0_i32_0 : i32, i32
  }
  func.func @transform_3(%arg0: i32) -> (i32, i32, i32) {
    %c0_i32 = arith.constant 0 : i32
    %c0_i32_0 = arith.constant 0 : i32
    %c0_i32_1 = arith.constant 0 : i32
    %c0_i32_2 = arith.constant 0 : i32
    return %c0_i32, %c0_i32_0, %c0_i32_1 : i32, i32, i32
  }
  func.func @transform_4(%arg0: i32) -> (i32, i32, i32) {
    %c0_i32 = arith.constant 0 : i32
    %c0_i32_0 = arith.constant 0 : i32
    %c0_i32_1 = arith.constant 0 : i32
    %c0_i32_2 = arith.constant 0 : i32
    return %c0_i32, %c0_i32_0, %c0_i32_1 : i32, i32, i32
  }
  func.func @transform_5(%arg0: i32) -> (i32, i32) {
    %c0_i32 = arith.constant 0 : i32
    %c0_i32_0 = arith.constant 0 : i32
    %c0_i32_1 = arith.constant 0 : i32
    return %c0_i32, %c0_i32_0 : i32, i32
  }
  func.func @transform_6(%arg0: i32) -> (i32, i32) {
    %c0_i32 = arith.constant 0 : i32
    %c0_i32_0 = arith.constant 0 : i32
    %c0_i32_1 = arith.constant 0 : i32
    return %c0_i32, %c0_i32_0 : i32, i32
  }
  func.func @transform_7(%arg0: i32) -> (i32, i32) {
    %c0_i32 = arith.constant 0 : i32
    %c0_i32_0 = arith.constant 0 : i32
    return %c0_i32, %arg0 : i32, i32
  }
}

</mosaic_0001>

<bundles_post_ra>
// kernel: tpu_custom_call.1
= control target key start
LH: loop header
LB: loop body
LE: loop exit
PB: predicated region body
PF: predicated region fallthrough
CT: control target
= control target key end

     0   :  { %s961_s0 = inlined_call_operand.vmem [shape: f32[2,8], index: 0, kind: input, shape index: {}]   ;;  %s962_s1 = inlined_call_operand.vmem [shape: f32[32,2], index: 1, kind: input, shape index: {}]   ;;  %s963_s2 = inlined_call_operand.vmem [shape: f32[32,1], index: 2, kind: input, shape index: {}]   ;;  %s964_s3 = inlined_call_operand.vmem [shape: f32[3,32,32], index: 3, kind: input, shape index: {}]   ;;  %s965_s4 = inlined_call_operand.vmem [shape: f32[3,32,1], index: 4, kind: input, shape index: {}]   ;;  %s966_s5 = inlined_call_operand.vmem [shape: f32[32,1], index: 5, kind: input, shape index: {}]   ;;  %s967_s6 = inlined_call_operand.<no memory space> [shape: f32[1,1], index: 6, kind: input, shape index: {}]   ;;  %s968_s7 = inlined_call_operand.hbm [shape: f32[1,8], index: 7, kind: output, shape index: {}]  }
   0x1   :  { %v12_v0 = vstv %s967_s6 }
   0x2   :  { %13 = vst [vmem:[#allocation2] sm:$0x1] %v12_v0 }
   0x3   :  { %v34_v1 = vld [vmem:[%s963_s2] sm:$0xff]  ;;  %v772_v3 = vmov 0   ;;  %v35_v4 = vld [vmem:[%s963_s2 + $0x8] sm:$0xff] }
   0x4   :  { %v30_v2 = vld [vmem:[%s962_s1] sm:$0xff]  ;;  %709 = vset.pattern.permute.xlu1 %v772_v3  ;;  %708 = vset.pattern.permute.xlu0 %v772_v3  ;;  %v31_v5 = vld [vmem:[%s962_s1 + $0x8] sm:$0xff] }
   0x5   :  { %68 = vperm.xlu1 %709, %v34_v1   ;;  %40 = vperm.xlu0 %708, %v30_v2  }
   0x6   :  { %14 = vsyncpa [#allocation4], 0  ;;  %v33_v6 = vld [vmem:[%s962_s1 + $0x18] sm:$0xff]  ;;  %v773_v7 = vmov 1   ;;  %v32_v8 = vld [vmem:[%s962_s1 + $0x10] sm:$0xff]  ;;  %vm150_vm0 = vcmask 261120   ;;  %v58_v29 = vlaneseq }
   0x7   :  { %v36_v9 = vld [vmem:[%s963_s2 + $0x10] sm:$0xff]  ;;  %v37_v10 = vld [vmem:[%s963_s2 + $0x18] sm:$0xff]  ;;  %v122_v11 = vld [vmem:[%s964_s3] sm:$0xff]  ;;  %vm542_vm1 = vcmask 64512   ;;  %vm567_vm2 = vcmask 57344  }
   0x8   :  { %643 = vmatprep.mubr.msk.f32.mxu0 %vm150_vm0, %v122_v11  ;;  %v126_v12 = vld [vmem:[%s965_s4] sm:$0xff]  ;;  %v127_v13 = vld [vmem:[%s965_s4 + $0x8] sm:$0xff]  ;;  %v128_v14 = vld [vmem:[%s965_s4 + $0x10] sm:$0xff]  ;;  %v894_v30 = vshrl.u32 %v58_v29, 7 }
   0x9   :  { %73 = vperm.xlu1 %709, %v35_v4   ;;  %45 = vperm.xlu0 %708, %v31_v5   ;;  %v591_v15 = vld [vmem:[%s965_s4 + $0x20] sm:$0xff]  ;;  %v129_v16 = vld [vmem:[%s965_s4 + $0x18] sm:$0xff]  ;;  %v593_v17 = vld [vmem:[%s965_s4 + $0x30] sm:$0xff] }
   0xa   :  { %v592_v18 = vld [vmem:[%s965_s4 + $0x28] sm:$0xff]  ;;  %v603_v19 = vld [vmem:[%s965_s4 + $0x40] sm:$0xff]  ;;  %v594_v20 = vld [vmem:[%s965_s4 + $0x38] sm:$0xff]  ;;  %v60_v33 = vsub.s32 0, %v894_v30  ;;  %v108_v35 = vsub.s32 1, %v894_v30 }
   0xb   :  { %v605_v21 = vld [vmem:[%s965_s4 + $0x50] sm:$0xff]  ;;  %v604_v22 = vld [vmem:[%s965_s4 + $0x48] sm:$0xff]  ;;  %v514_v23 = vld [vmem:[%s966_s5] sm:$0xff] }
   0xc   :  { %v606_v24 = vld [vmem:[%s965_s4 + $0x58] sm:$0xff]  ;;  %v516_v25 = vld [vmem:[%s966_s5 + $0x10] sm:$0xff]  ;;  %v515_v26 = vld [vmem:[%s966_s5 + $0x8] sm:$0xff] }
   0xd   :  { %710 = vset.pattern.permute.xlu1 %v773_v7  ;;  %55 = vperm.xlu0 %708, %v33_v6   ;;  %v556_v27 = vld [vmem:[#allocation2] sm:$0x1]  ;;  %v517_v28 = vld [vmem:[%s966_s5 + $0x18] sm:$0xff]  ;;  %v589_v29 = vld [vmem:[%s964_s3 + $0x30] sm:$0xff] }
   0xe   :  { %95 = vperm.xlu1 %710, %v31_v5   ;;  %v29_v34 = vld [vmem:[%s961_s0] sm:$0x3] }
   0xf   :  { %v61_v38 = vrot.slane %v29_v34, %v60_v33  ;;  %v109_v39 = vrot.slane %v29_v34, %v108_v35  ;;  %v601_v34 = vld [vmem:[%s964_s3 + $0x50] sm:$0xff] }
  0x11   :  { %712 = vset.pattern.permute.xlu0 %v773_v7 }
  0x12   :  { %711 = vset.pattern.permute.xlu1 %v772_v3  ;;  %91 = vperm.xlu0 %712, %v30_v2  }
  0x13   :  { %50 = vperm.xlu1 %711, %v32_v8  }
  0x16   :  { %99 = vperm.xlu0 %712, %v32_v8   ;;  %v125_v8 = vld [vmem:[%s964_s3 + $0x18] sm:$0xff] }
  0x17   :  { %78 = vperm.xlu1 %711, %v36_v9   ;;  %v587_v9 = vld [vmem:[%s964_s3 + $0x20] sm:$0xff] }
  0x18   :  { %657 = vmatprep.mubr.msk.f32.mxu1 %vm150_vm0, %v587_v9 }
  0x1a   :  { %715 = vset.pattern.permute.xlu0 %v772_v3 }
  0x1b   :  { %83 = vperm.xlu1 %711, %v37_v10   ;;  %137 = vperm.xlu0 %715, %v127_v13  }
  0x1f   :  { %713 = vset.pattern.permute.xlu1 %v773_v7  ;;  %264 = vperm.xlu0 %715, %v591_v15   ;;  %v124_v7 = vld [vmem:[%s964_s3 + $0x10] sm:$0xff] }
  0x20   :  { %103 = vperm.xlu1 %713, %v33_v6   ;;  %v123_v6 = vld [vmem:[%s964_s3 + $0x8] sm:$0xff] }
  0x23   :  { %274 = vperm.xlu0 %715, %v593_v17  }
  0x24   :  { %714 = vset.pattern.permute.xlu1 %v772_v3 }
  0x25   :  { %132 = vperm.xlu1 %714, %v126_v12  }
  0x27   :  { %395 = vperm.xlu0 %715, %v603_v19  }
  0x29   :  { %142 = vperm.xlu1 %714, %v128_v14  }
  0x2b   :  { %405 = vperm.xlu0 %715, %v605_v21  }
  0x2d   :  { %147 = vperm.xlu1 %714, %v129_v16  }
  0x2f   :  { %520 = vperm.xlu0 %715, %v514_v23  }
  0x31   :  { %269 = vperm.xlu1 %714, %v592_v18  }
  0x33   :  { %530 = vperm.xlu0 %715, %v516_v25  }
  0x35   :  { %279 = vperm.xlu1 %714, %v594_v20  }
  0x37   :  { %559 = vperm.xlu0 %715, %v556_v27  }
  0x39   :  { %400 = vperm.xlu1 %714, %v604_v22  }
  0x3d   :  { %410 = vperm.xlu1 %714, %v606_v24  }
  0x41   :  { %525 = vperm.xlu1 %714, %v515_v26  }
  0x45   :  { %535 = vperm.xlu1 %714, %v517_v28   ;;  %v588_v28 = vld [vmem:[%s964_s3 + $0x28] sm:$0xff] }
  0x84   :  { %v69_v31 = vpop.permute.xlu1 %68  ;;  %v41_v32 = vpop.permute.xlu0 %40 }
  0x85   :  { %v62_v43 = vmul.f32 %v61_v38, %v41_v32  ;;  %v599_v32 = vld [vmem:[%s964_s3 + $0x40] sm:$0xff] }
  0x87   :  { %v86_v48 = vadd.f32 %v69_v31, %v62_v43  ;;  %v590_v31 = vld [vmem:[%s964_s3 + $0x38] sm:$0xff] }
  0x88   :  { %v74_v36 = vpop.permute.xlu1 %73  ;;  %v46_v37 = vpop.permute.xlu0 %45 }
  0x89   :  { %v63_v40 = vmul.f32 %v61_v38, %v46_v37 }
  0x8b   :  { %v87_v45 = vadd.f32 %v74_v36, %v63_v40 }
  0x8c   :  { %v56_v41 = vpop.permute.xlu0 %55 }
  0x8d   :  { %v96_v42 = vpop.permute.xlu1 %95  ;;  %v65_v58 = vmul.f32 %v61_v38, %v56_v41 }
  0x8e   :  { %v111_v44 = vmul.f32 %v109_v39, %v96_v42 }
  0x90   :  { %v115_v46 = vadd.f32 %v111_v44, %v87_v45 }
  0x91   :  { %v92_v47 = vpop.permute.xlu0 %91 }
  0x92   :  { %v110_v49 = vmul.f32 %v109_v39, %v92_v47  ;;  %v51_v50 = vpop.permute.xlu1 %50  ;;  %716 = vtanh.f32 %v115_v46 }
  0x93   :  { %v64_v54 = vmul.f32 %v61_v38, %v51_v50 }
  0x94   :  { %v114_v51 = vadd.f32 %v110_v49, %v86_v48 }
  0x95   :  { %v100_v53 = vpop.permute.xlu0 %99 }
  0x96   :  { %718 = vtanh.f32 %v114_v51  ;;  %v79_v52 = vpop.permute.xlu1 %78  ;;  %v112_v57 = vmul.f32 %v109_v39, %v100_v53  ;;  %v600_v53 = vld [vmem:[%s964_s3 + $0x48] sm:$0xff] }
  0x97   :  { %v88_v56 = vadd.f32 %v79_v52, %v64_v54  ;;  %v602_v54 = vld [vmem:[%s964_s3 + $0x58] sm:$0xff]  ;;  %s774_s3 = smov [#allocation3]  }
  0x98   :  { %s575_s20 = sshll.u32 %s774_s3, 4  ;;  %s576_s20 = int_to_ptr.vmem [resolvable:$true] %s575_s20 }
  0x99   :  { %v116_v60 = vadd.f32 %v112_v57, %v88_v56  ;;  %s748_s21 = scalar_lea.vmem %s576_s20, 16  ;;  %s752_s22 = scalar_lea.vmem %s576_s20, 32 }
  0x9a   :  { %v84_v55 = vpop.permute.xlu1 %83  ;;  %v138_v12 = vpop.permute.xlu0 %137  ;;  %p749_p0 = scmp.ne.s32.totalorder %s576_s20, %s748_s21  ;;  %p753_p1 = scmp.lt.s32.totalorder %s576_s20, %s576_s20 }
  0x9b   :  { %v89_v63 = vadd.f32 %v84_v55, %v65_v58  ;;  %720 = vtanh.f32 %v116_v60  ;;  %p754_p2 = scmp.lt.s32.totalorder %s752_s22, %s748_s21 }
  0x9c   :  { %v717_v59 = vpop.eup %716 }
  0x9d   :  { %p755_p3 = por %p754_p2, %p753_p1 }
  0x9e   :  { %v265_v36 = vpop.permute.xlu0 %264 }
  0x9f   :  { %v104_v61 = vpop.permute.xlu1 %103  ;;  %p756_p4 = pnand %p755_p3, %p749_p0 }
  0xa0   :  { %v719_v62 = vpop.eup %718  ;;  %v113_v0 = vmul.f32 %v109_v39, %v104_v61 }
  0xa1   :  { %v677_v1 = vpack.c.bf16 %v717_v59, %v719_v62 }
  0xa2   :  { %v117_v2 = vadd.f32 %v113_v0, %v89_v63  ;;  %v275_v43 = vpop.permute.xlu0 %274 }
  0xa3   :  { %678 = vmatprep.subr.bf16.mxu0 %v677_v1 }
  0xa4   :  { %722 = vtanh.f32 %v117_v2  ;;  %680 = vmatpush3.bf16.msra.mxu0 %v677_v1  ;;  %v133_v10 = vpop.permute.xlu1 %132 }
  0xa5   :  { %v721_v3 = vpop.eup %720 }
  0xa6   :  { %v396_v56 = vpop.permute.xlu0 %395 }
  0xa8   :  { %v143_v11 = vpop.permute.xlu1 %142 }
  0xaa   :  { %v406_v58 = vpop.permute.xlu0 %405 }
  0xac   :  { %v148_v17 = vpop.permute.xlu1 %147 }
  0xae   :  { %v723_v4 = vpop.eup %722 }
  0xaf   :  { %v681_v5 = vpack.c.bf16 %v723_v4, %v721_v3  ;;  %v521_v3 = vpop.permute.xlu0 %520 }
  0xb0   :  { %v270_v35 = vpop.permute.xlu1 %269 }
  0xb1   :  { %682 = vmatprep.subr.bf16.mxu0 %v681_v5 }
  0xb2   :  { %684 = vmatpush3.bf16.msra.mxu0 %v681_v5 }
  0xb4   :  { %v280_v41 = vpop.permute.xlu1 %279 }
  0xb5   :  { %644 = vmatmul.mubr.msk.f32.vlgmr.msra.gmra.mrb[0].mxu0 %vm150_vm0, %v123_v6 }
  0xb6   :  { %646 = vmatprep.mubr.msk.f32.mxu0 %vm150_vm0, %v124_v7 }
  0xb8   :  { %v401_v55 = vpop.permute.xlu1 %400 }
  0xb9   :  { %647 = vmatmul.mubr.msk.f32.gmra.mrb[2].mxu0 %vm150_vm0, %v125_v8 }
  0xba   :  { %671 = vmatprep.mubr.msk.f32.mxu0 %vm150_vm0, %v599_v32 }
  0xbc   :  { %v411_v57 = vpop.permute.xlu1 %410 }
  0xc0   :  { %v526_v4 = vpop.permute.xlu1 %525 }
 0x188   :  { %v645_v13 = vpop.f32.mrb[0].mxu0 }
 0x189   :  { %v235_v14 = vadd.f32 %v645_v13, %v138_v12  ;;  %v229_v15 = vpop.f32.mrb[1].mxu0  ;;  %v536_v13 = vpop.permute.xlu1 %535 }
 0x18a   :  { %v230_v16 = vadd.f32 %v229_v15, %v133_v10  ;;  %v531_v10 = vpop.permute.xlu0 %530 }
 0x18b   :  { %724 = vtanh.f32 %v235_v14 }
 0x18c   :  { %726 = vtanh.f32 %v230_v16  ;;  %v648_v18 = vpop.f32.mrb[2].mxu0 }
 0x18d   :  { %v245_v19 = vadd.f32 %v648_v18, %v148_v17  ;;  %v239_v20 = vpop.f32.mrb[3].mxu0 }
 0x18e   :  { %v240_v21 = vadd.f32 %v239_v20, %v143_v11 }
 0x18f   :  { %728 = vtanh.f32 %v245_v19 }
 0x190   :  { %730 = vtanh.f32 %v240_v21 }
 0x195   :  { %v725_v22 = vpop.eup %724 }
 0x196   :  { %v727_v23 = vpop.eup %726 }
 0x197   :  { %v685_v24 = vpack.c.bf16 %v725_v22, %v727_v23 }
 0x199   :  { %v729_v25 = vpop.eup %728  ;;  %686 = vmatprep.subr.bf16.mxu1 %v685_v24 }
 0x19a   :  { %v731_v26 = vpop.eup %730  ;;  %688 = vmatpush3.bf16.msra.mxu1 %v685_v24 }
 0x19b   :  { %v689_v27 = vpack.c.bf16 %v729_v25, %v731_v26  ;;  %v560_v26 = vpop.permute.xlu0 %559 }
 0x19d   :  { %690 = vmatprep.subr.bf16.mxu1 %v689_v27 }
 0x19e   :  { %692 = vmatpush3.bf16.msra.mxu1 %v689_v27 }
 0x1a1   :  { %658 = vmatmul.mubr.msk.f32.vlgmr.msra.gmra.mrb[0].mxu1 %vm150_vm0, %v588_v28  ;;  %v565_v28 = vrot.slane %v560_v26, %v60_v33 }
 0x1a2   :  { %660 = vmatprep.mubr.msk.f32.mxu1 %vm150_vm0, %v589_v29 }
 0x1a5   :  { %661 = vmatmul.mubr.msk.f32.gmra.mrb[2].mxu1 %vm150_vm0, %v590_v31 }
 0x1a6   :  { %674 = vmatprep.mubr.msk.f32.mxu1 %vm150_vm0, %v601_v34 }
 0x274   :  { %v659_v37 = vpop.f32.mrb[0].mxu1 }
 0x275   :  { %v366_v38 = vadd.f32 %v659_v37, %v270_v35  ;;  %v360_v39 = vpop.f32.mrb[1].mxu1 }
 0x276   :  { %v361_v40 = vadd.f32 %v360_v39, %v265_v36 }
 0x277   :  { %732 = vtanh.f32 %v366_v38 }
 0x278   :  { %734 = vtanh.f32 %v361_v40  ;;  %v662_v42 = vpop.f32.mrb[2].mxu1 }
 0x279   :  { %v376_v44 = vadd.f32 %v662_v42, %v280_v41  ;;  %v370_v45 = vpop.f32.mrb[3].mxu1 }
 0x27a   :  { %v371_v46 = vadd.f32 %v370_v45, %v275_v43 }
 0x27b   :  { %736 = vtanh.f32 %v376_v44 }
 0x27c   :  { %738 = vtanh.f32 %v371_v46 }
 0x281   :  { %v733_v47 = vpop.eup %732 }
 0x282   :  { %v735_v48 = vpop.eup %734 }
 0x283   :  { %v693_v49 = vpack.c.bf16 %v733_v47, %v735_v48 }
 0x285   :  { %v737_v50 = vpop.eup %736  ;;  %694 = vmatprep.subr.bf16.mxu0 %v693_v49  ;;  %701 = vmatprep.subr.bf16.mxu1 %v693_v49 }
 0x286   :  { %v739_v51 = vpop.eup %738  ;;  %696 = vmatpush3.bf16.msra.mxu0 %v693_v49  ;;  %703 = vmatpush3.bf16.msra.mxu1 %v693_v49 }
 0x287   :  { %v697_v52 = vpack.c.bf16 %v737_v50, %v739_v51 }
 0x289   :  { %698 = vmatprep.subr.bf16.mxu0 %v697_v52  ;;  %702 = vmatprep.subr.bf16.mxu1 %v697_v52 }
 0x28a   :  { %700 = vmatpush3.bf16.msra.mxu0 %v697_v52  ;;  %704 = vmatpush3.bf16.msra.mxu1 %v697_v52 }
 0x28d   :  { %672 = vmatmul.mubr.msk.f32.vlgmr.msra.gmra.mrb[4].mxu0 %vm150_vm0, %v600_v53  ;;  %675 = vmatmul.mubr.msk.f32.vlgmr.msra.gmra.mrb[4].mxu1 %vm150_vm0, %v602_v54 }
 0x360   :  { %v673_v59 = vpop.f32.mrb[4].mxu0  ;;  %v676_v60 = vpop.f32.mrb[4].mxu1 }
 0x361   :  { %v497_v61 = vadd.f32 %v673_v59, %v401_v55  ;;  %v507_v62 = vadd.f32 %v676_v60, %v411_v57  ;;  %v491_v63 = vpop.f32.mrb[5].mxu0  ;;  %v501_v0 = vpop.f32.mrb[5].mxu1 }
 0x362   :  { %v492_v1 = vadd.f32 %v491_v63, %v396_v56  ;;  %v502_v2 = vadd.f32 %v501_v0, %v406_v58 }
 0x363   :  { %740 = vtanh.f32 %v497_v61 }
 0x364   :  { %742 = vtanh.f32 %v507_v62 }
 0x365   :  { %744 = vtanh.f32 %v492_v1 }
 0x366   :  { %746 = vtanh.f32 %v502_v2 }
 0x36d   :  { %v741_v5 = vpop.eup %740 }
 0x36e   :  { %v743_v6 = vpop.eup %742  ;;  %v539_v7 = vmul.f32 %v741_v5, %v526_v4 }
 0x36f   :  { %v745_v8 = vpop.eup %744  ;;  %v541_v15 = vmul.f32 %v743_v6, %v536_v13 }
 0x370   :  { %v747_v9 = vpop.eup %746  ;;  %v544_v11 = vsel %vm542_vm1, %v539_v7, 0.0  ;;  %v538_v12 = vmul.f32 %v745_v8, %v521_v3 }
 0x371   :  { %v540_v14 = vmul.f32 %v747_v9, %v531_v10  ;;  %v548_v20 = vsel %vm542_vm1, %v541_v15, 0.0 }
 0x372   :  { %v543_v16 = vsel %vm542_vm1, %v538_v12, 0.0 }
 0x373   :  { %v545_v17 = vadd.f32 %v544_v11, %v543_v16  ;;  %v546_v18 = vsel %vm542_vm1, %v540_v14, 0.0 }
 0x375   :  { %v547_v19 = vadd.f32 %v546_v18, %v545_v17 }
 0x377   :  { %v549_v21 = vadd.f32 %v548_v20, %v547_v19 }
 0x379   :  { %v550_v22 = vrot.slane %v549_v21, 4 }
 0x37b   :  { %v551_v23 = vadd.f32 %v550_v22, %v549_v21 }
 0x37d   :  { %v552_v24 = vrot.slane %v551_v23, 2 }
 0x37f   :  { %v553_v25 = vadd.f32 %v552_v24, %v551_v23 }
 0x381   :  { %v554_v27 = vrot.slane %v553_v25, 1 }
 0x383   :  { %v555_v29 = vadd.f32 %v554_v27, %v553_v25 }
 0x385   :  { %v566_v31 = vadd.f32 %v565_v28, %v555_v29 }
 0x387   :  { %568 = vst.msk [vmem:[#allocation3] sm:$0x1] %vm567_vm2, %v566_v31 }
 0x388   :  { %759 = shalt.err (!%p756_p4)
}
 0x389   :  { %s760_s4 = scalar_lea.hbm %s968_s7, 16 }
 0x38a   :  { %p761_p5 = scmp.ne.s32.totalorder %s968_s7, %s760_s4  ;;  %p764_p6 = scmp.lt.u32.totalorder %s760_s4, %s968_s7 }
 0x38c   :  { %p766_p7 = pnand %p764_p6, %p761_p5 }
 0x38e   :  { %769 = shalt.err (!%p766_p7)
}
 0x38f   :  { %578 = dma.vmem_to_hbm [thread:$0]  %s576_s20, 16, %s968_s7, [#allocation4]  }
 0x390   :  { %770 = dma.done.wait [#allocation4], 16  }
 0x391   :  { %771 = vsyncadd [#allocation4], 4294967280 }
 0x392   :  { %582 = vsyncpa [#allocation4], 1 }

</bundles_post_ra>
